<compile_context>
chip_gen: v7x
topology: tpu7x:2x2x1
jax: 0.10.0
libtpu: 0.0.40
codegen_flags: <defaults>
</compile_context>

<pallas_src>
import functools

import numpy as np
import jax
import jax.numpy as jnp
from jax.experimental import pallas as pl
from jax.experimental.pallas import tpu as pltpu


# ------------------------------ helpers ---------------------------------------

def _cdiv(a, b):
    return -(-a // b)


def _dsl(start, size, stride):
    """pl.ds with optional stride (plain slice when stride == 1)."""
    return pl.ds(start, size) if stride == 1 else pl.ds(start, size, stride=stride)


# ------------------------------ Pallas kernel ---------------------------------

def _conv3x3_kernel(*refs, s, TO, Wp, WO, Cin, Cout, SH, cdt, has_next):
    """One (batch, row-tile) step of a 3x3 / pad-1 / stride-s conv + bias.

    refs (has_next=True,  s==1): prev, body, next, w, b, out, slab, fat
    refs (has_next=False, s>=2): prev, body,       w, b, out, slab, fat

    prev: (1, 1, Wp, Cin)        input row just above the body rows
    body: (1, s*TO, Wp, Cin)     input rows covered by this output tile
    next: (1, 1, Wp, Cin)        input row just below the body rows (s==1 only)
    w:    (3, 3*Cin, Cout)       taps packed as [kh][kw*Cin + ci, co]
    b:    (1, Cout)
    out:  (1, TO, WO, Cout)
    slab: (SH, SW, Cin)          VMEM scratch: zero-padded halo slab
    fat:  (SH, WO, 3*Cin)        VMEM scratch: kw-shifted views packed on lanes
    """
    if has_next:
        prev_ref, body_ref, next_ref, w_ref, b_ref, o_ref, slab_ref, fat_ref = refs
    else:
        prev_ref, body_ref, w_ref, b_ref, o_ref, slab_ref, fat_ref = refs

    i = pl.program_id(1)
    nt = pl.num_programs(1)
    body_rows = s * TO

    # ---- assemble the zero-padded halo slab in VMEM (replaces HBM jnp.pad) ---
    zero_col = jnp.zeros((SH, Cin), cdt)
    slab_ref[:, 0, :] = zero_col                              # left pad column
    if s == 1:
        slab_ref[:, Wp + 1, :] = zero_col                     # right pad column
    slab_ref[1:body_rows + 1, 1:Wp + 1, :] = body_ref[0].astype(cdt)

    zero_row = jnp.zeros((Wp, Cin), cdt)

    @pl.when(i == 0)                                          # top image border
    def _top_pad():
        slab_ref[0, 1:Wp + 1, :] = zero_row

    @pl.when(i > 0)                                           # interior halo row
    def _top_halo():
        slab_ref[0, 1:Wp + 1, :] = prev_ref[0, 0].astype(cdt)

    if has_next:   # stride==1 only: bottom halo row is actually read (kh==2)
        @pl.when(i == nt - 1)                                 # bottom border
        def _bot_pad():
            slab_ref[body_rows + 1, 1:Wp + 1, :] = zero_row

        @pl.when(i < nt - 1)
        def _bot_halo():
            slab_ref[body_rows + 1, 1:Wp + 1, :] = next_ref[0, 0].astype(cdt)

    # ---- pack 3 kw-shifted (column-strided for stride>1) views on lanes ------
    # Direct slice stores (no jnp.concatenate temporary).
    for kw in range(3):
        fat_ref[:, :, kw * Cin:(kw + 1) * Cin] = slab_ref[:, _dsl(kw, WO, s), :]

    # ---- 3 fat MXU dots (K = 3*Cin), f32 accumulation, bias folded into init -
    acc = jnp.broadcast_to(b_ref[...].astype(jnp.float32), (TO * WO, Cout))
    for kh in range(3):
        rows = fat_ref[_dsl(kh, TO, s)]                       # (TO, WO, 3*Cin)
        acc = acc + jnp.dot(rows.reshape(TO * WO, 3 * Cin), w_ref[kh],
                            preferred_element_type=jnp.float32)
    o_ref[0] = acc.reshape(TO, WO, Cout).astype(o_ref.dtype)


# ------------------------------ sizing helpers --------------------------------

def _vmem_estimate(TO, s, Wp, WO, Cin, Cout, in_b, out_b, cd_b):
    """Per-step VMEM bytes: double-buffered I/O + scratch + compiler temps."""
    SH = s * TO + (2 if s == 1 else 1)
    SW = Wp + (2 if s == 1 else 1)
    body = s * TO * Wp * Cin * in_b
    halo = (2 if s == 1 else 1) * Wp * Cin * in_b
    outb = TO * WO * Cout * out_b
    wts = 9 * Cin * Cout * cd_b + 4 * Cout
    slab = SH * SW * Cin * cd_b
    fat = SH * WO * 3 * Cin * cd_b
    lhs_tmp = TO * WO * 3 * Cin * cd_b       # per-kh LHS materialization
    acc = TO * WO * Cout * 4                 # f32 accumulator
    dot_partial = TO * WO * Cout * 4         # per-dot f32 partial
    total = 2 * (body + halo + outb + wts) + slab + fat + lhs_tmp + acc + dot_partial
    return int(1.3 * total)                  # safety factor for compiler temps


def _pick_row_tile(HO_t, N, s, Wp, WO, Cin, Cout, in_b, out_b, cd_b, budget):
    """Largest row tile fitting the budget, balanced and megacore-friendly."""
    cap = 1
    for t in range(1, HO_t + 1):             # estimate is monotone in t
        if _vmem_estimate(t, s, Wp, WO, Cin, Cout, in_b, out_b, cd_b) <= budget:
            cap = t
        else:
            break
    n_tiles = _cdiv(HO_t, cap)
    # Keep both TensorCores busy (v7x) / avoid a 1-point parallel grid.
    if N * n_tiles < 2 and HO_t >= 2:
        n_tiles = 2
    if N == 1 and n_tiles % 2 == 1 and n_tiles < HO_t:
        n_tiles += 1
    return _cdiv(HO_t, n_tiles)              # balanced tile, minimal padding


# ------------------------------ public wrappers --------------------------------

def conv3x3_norm_nhwc(x, w_hwio, b, *, stride=1, compute_dtype=jnp.bfloat16,
                      row_tile=None, vmem_budget_bytes=None):
    """Conv3x3Norm forward (use_gn=False => identity norm), channels-last.

    x:      (N, H, W, Cin)   NHWC
    w_hwio: (3, 3, Cin, Cout)
    b:      (Cout,)
    returns (N, ceil(H/stride), ceil(W/stride), Cout), dtype = x.dtype
    """
    N, H, W, Cin = x.shape
    kh_, kw_, wcin, Cout = w_hwio.shape
    assert (kh_, kw_) == (3, 3) and wcin == Cin
    s = int(stride)
    assert s >= 1

    # PyTorch Conv2d(k=3, stride=s, padding=1) output size (handles odd H/W).
    HO_t = (H - 1) // s + 1
    WO_t = (W - 1) // s + 1

    # Kernel-side output width: multiple of 8 so reshapes / stores are layout
    # no-ops.  Input is zero-padded to match; output cropped back afterwards.
    WO = _cdiv(WO_t, 8) * 8
    Wp = s * WO

    in_b = np.dtype(x.dtype).itemsize
    out_b = in_b
    cd_b = np.dtype(compute_dtype).itemsize

    # Generation-aware VMEM budgeting (64 MiB on v7x, 128 MiB on v5e/v6e).
    try:
        vmem_cap = int(pltpu.get_tpu_info().vmem_capacity_bytes)
    except Exception:
        vmem_cap = 64 * 2**20                       # v7x-safe fallback
    if vmem_budget_bytes is None:
        vmem_budget_bytes = max(16 * 2**20, vmem_cap // 2 - 4 * 2**20)

    if row_tile is None:
        TO = _pick_row_tile(HO_t, N, s, Wp, WO, Cin, Cout, in_b, out_b, cd_b,
                            vmem_budget_bytes)
    else:
        TO = max(1, min(int(row_tile), HO_t))
    n_tiles = _cdiv(HO_t, TO)
    HO_k = n_tiles * TO
    Hp = s * HO_k

    # Minimal zero padding in HBM only when the shape actually requires it.
    if (Hp, Wp) != (H, W):
        x = jnp.pad(x, ((0, 0), (0, Hp - H), (0, Wp - W), (0, 0)))

    has_next = (s == 1)                    # stride>=2: bottom halo never read
    SH = s * TO + (2 if s == 1 else 1)
    SW = Wp + (2 if s == 1 else 1)

    # Weights packed as (kh, kw*Cin + ci, co); bias kept in f32.
    w3 = jnp.asarray(w_hwio).reshape(3, 3 * Cin, Cout).astype(compute_dtype)
    b2 = jnp.asarray(b).reshape(1, Cout).astype(jnp.float32)

    est = _vmem_estimate(TO, s, Wp, WO, Cin, Cout, in_b, out_b, cd_b)
    vmem_limit = int(min(vmem_cap * 7 // 8, max(32 * 2**20, 2 * est)))

    kernel = functools.partial(_conv3x3_kernel, s=s, TO=TO, Wp=Wp, WO=WO,
                               Cin=Cin, Cout=Cout, SH=SH, cdt=compute_dtype,
                               has_next=has_next)

    body_rows = s * TO
    body_spec = pl.BlockSpec((1, body_rows, Wp, Cin), lambda n, i: (n, i, 0, 0))
    # 1-row halo blocks: block size 1 along H => block index == row index.
    prev_spec = pl.BlockSpec(
        (1, 1, Wp, Cin),
        lambda n, i: (n, jnp.maximum(i * body_rows - 1, 0), 0, 0))
    w_spec = pl.BlockSpec((3, 3 * Cin, Cout), lambda n, i: (0, 0, 0))
    b_spec = pl.BlockSpec((1, Cout), lambda n, i: (0, 0))
    out_spec = pl.BlockSpec((1, TO, WO, Cout), lambda n, i: (n, i, 0, 0))

    in_specs = [prev_spec, body_spec]
    inputs = [x, x]
    if has_next:
        next_spec = pl.BlockSpec(
            (1, 1, Wp, Cin),
            lambda n, i: (n, jnp.minimum((i + 1) * body_rows, Hp - 1), 0, 0))
        in_specs.append(next_spec)
        inputs.append(x)
    in_specs += [w_spec, b_spec]
    inputs += [w3, b2]

    cost = pl.CostEstimate(
        flops=2 * 9 * N * HO_k * WO * Cin * Cout,
        transcendentals=0,
        bytes_accessed=int(N * Hp * Wp * Cin * in_b + 9 * Cin * Cout * cd_b
                           + N * HO_k * WO * Cout * out_b))

    y = pl.pallas_call(
        kernel,
        out_shape=jax.ShapeDtypeStruct((N, HO_k, WO, Cout), x.dtype),
        grid=(N, n_tiles),
        in_specs=in_specs,
        out_specs=out_spec,
        scratch_shapes=[pltpu.VMEM((SH, SW, Cin), compute_dtype),
                        pltpu.VMEM((SH, WO, 3 * Cin), compute_dtype)],
        compiler_params=pltpu.CompilerParams(
            dimension_semantics=("parallel", "parallel"),
            vmem_limit_bytes=vmem_limit),
        cost_estimate=cost,
    )(*inputs)

    return y[:, :HO_t, :WO_t, :]             # crop the alignment padding


def conv3x3_norm(x_nchw, w_hwio, b, *, stride=1, compute_dtype=jnp.bfloat16,
                 row_tile=None):
    """NCHW interface matching the PyTorch module (transposes are edge glue)."""
    x = jnp.transpose(x_nchw, (0, 2, 3, 1))            # NCHW -> NHWC
    y = conv3x3_norm_nhwc(x, w_hwio, b, stride=stride,
                          compute_dtype=compute_dtype, row_tile=row_tile)
    return jnp.transpose(y, (0, 3, 1, 2))               # NHWC -> NCHW


# ------------------------------ pure-JAX reference -----------------------------

def _ref_conv3x3(x_nchw, w_hwio, b, stride):
    x = jnp.transpose(x_nchw, (0, 2, 3, 1)).astype(jnp.float32)
    y = jax.lax.conv_general_dilated(
        x, w_hwio.astype(jnp.float32), window_strides=(stride, stride),
        padding=((1, 1), (1, 1)),
        dimension_numbers=("NHWC", "HWIO", "NHWC"),
        precision=jax.lax.Precision.HIGHEST)
    y = y + b.reshape(1, 1, 1, -1)
    return jnp.transpose(y, (0, 3, 1, 2))


# ------------------------------ main -------------------------------------------

if __name__ == "__main__":
    key = jax.random.PRNGKey(0)
    kx, kw, kb = jax.random.split(key, 3)

    N, Cin, Cout, H, W = 2, 4, 8, 16, 16
    x = jax.random.normal(kx, (N, Cin, H, W), jnp.float32)            # NCHW
    w = 0.05 * jax.random.normal(kw, (3, 3, Cin, Cout), jnp.float32)  # HWIO
    b = 0.1 * jax.random.normal(kb, (Cout,), jnp.float32)

    # stride=1, f32 path, forced small row tile (top/interior/bottom halos +
    # non-divisible tile padding: 16 output rows, tile 3).
    y1 = jax.block_until_ready(
        conv3x3_norm(x, w, b, stride=1, compute_dtype=jnp.float32, row_tile=3))
    np.testing.assert_allclose(np.asarray(y1),
                               np.asarray(_ref_conv3x3(x, w, b, 1)),
                               rtol=2e-2, atol=5e-3)

    # stride=2, f32 path, auto row tile (strided reads, no bottom-halo DMA).
    y2 = jax.block_until_ready(
        conv3x3_norm(x, w, b, stride=2, compute_dtype=jnp.float32))
    np.testing.assert_allclose(np.asarray(y2),
                               np.asarray(_ref_conv3x3(x, w, b, 2)),
                               rtol=2e-2, atol=5e-3)

    # stride=2 with odd spatial size (PyTorch ceil semantics) + bf16 MXU path.
    xo = jax.random.normal(kx, (1, Cin, 15, 15), jnp.float32)
    y3 = jax.block_until_ready(conv3x3_norm(xo, w, b, stride=2))
    np.testing.assert_allclose(np.asarray(y3),
                               np.asarray(_ref_conv3x3(xo, w, b, 2)),
                               rtol=5e-2, atol=2e-2)

    print("KERNEL_OK")
</pallas_src>

<mosaic_0001>
module attributes {stable_mosaic.version = 11 : i64} {
  func.func @_conv3x3_kernel(%arg0: i32, %arg1: i32, %arg2: memref<1x1x16x4xf32, #tpu.memory_space<vmem>>, %arg3: memref<1x3x16x4xf32, #tpu.memory_space<vmem>>, %arg4: memref<1x1x16x4xf32, #tpu.memory_space<vmem>>, %arg5: memref<3x12x8xf32, #tpu.memory_space<vmem>>, %arg6: memref<1x8xf32, #tpu.memory_space<vmem>>, %arg7: memref<1x3x16x8xf32, #tpu.memory_space<vmem>>, %arg8: memref<5x18x4xf32, #tpu.memory_space<vmem>>, %arg9: memref<5x16x12xf32, #tpu.memory_space<vmem>>) attributes {dimension_semantics = [#tpu.dimension_semantics<parallel>, #tpu.dimension_semantics<parallel>], iteration_bounds = array<i64: 2, 6>, scalar_prefetch = 0 : i64, scratch_operands = 2 : i64, tpu.core_type = #tpu.core_type<tc>, window_params = [{transform_indices = @transform_0, window_bounds = array<i64: 1, 1, 16, 4>}, {transform_indices = @transform_1, window_bounds = array<i64: 1, 3, 16, 4>}, {transform_indices = @transform_2, window_bounds = array<i64: 1, 1, 16, 4>}, {pipeline_mode = #tpu.pipeline_mode<synchronous>, transform_indices = @transform_3, window_bounds = array<i64: 3, 12, 8>}, {pipeline_mode = #tpu.pipeline_mode<synchronous>, transform_indices = @transform_4, window_bounds = array<i64: 1, 8>}, {transform_indices = @transform_5, window_bounds = array<i64: 1, 3, 16, 8>}]} {
    %cst = arith.constant 0.000000e+00 : f32
    %0 = vector.broadcast %cst : f32 to vector<5x4xf32>
    %c0 = arith.constant 0 : index
    %c0_0 = arith.constant 0 : index
    %c0_1 = arith.constant 0 : index
    %1 = vector.load %arg8[%c0, %c0_0, %c0_1] : memref<5x18x4xf32, #tpu.memory_space<vmem>>, vector<5x1x4xf32>
    %2 = vector.shape_cast %1 : vector<5x1x4xf32> to vector<5x4xf32>
    %3 = vector.shape_cast %0 : vector<5x4xf32> to vector<5x1x4xf32>
    tpu.vector_store %arg8[%c0, %c0_0, %c0_1], %3 {strides = array<i32>} : memref<5x18x4xf32, #tpu.memory_space<vmem>>, vector<5x1x4xf32>,
    %c0_2 = arith.constant 0 : index
    %c17 = arith.constant 17 : index
    %c0_3 = arith.constant 0 : index
    %4 = vector.load %arg8[%c0_2, %c17, %c0_3] : memref<5x18x4xf32, #tpu.memory_space<vmem>>, vector<5x1x4xf32>
    %5 = vector.shape_cast %4 : vector<5x1x4xf32> to vector<5x4xf32>
    %6 = vector.shape_cast %0 : vector<5x4xf32> to vector<5x1x4xf32>
    tpu.vector_store %arg8[%c0_2, %c17, %c0_3], %6 {strides = array<i32>} : memref<5x18x4xf32, #tpu.memory_space<vmem>>, vector<5x1x4xf32>,
    %c0_4 = arith.constant 0 : index
    %c0_5 = arith.constant 0 : index
    %c0_6 = arith.constant 0 : index
    %c0_7 = arith.constant 0 : index
    %7 = vector.load %arg3[%c0_4, %c0_5, %c0_6, %c0_7] : memref<1x3x16x4xf32, #tpu.memory_space<vmem>>, vector<1x3x16x4xf32>
    %8 = vector.shape_cast %7 : vector<1x3x16x4xf32> to vector<3x16x4xf32>
    %c1 = arith.constant 1 : index
    %c1_8 = arith.constant 1 : index
    %c0_9 = arith.constant 0 : index
    %9 = vector.load %arg8[%c1, %c1_8, %c0_9] : memref<5x18x4xf32, #tpu.memory_space<vmem>>, vector<3x16x4xf32>
    tpu.vector_store %arg8[%c1, %c1_8, %c0_9], %8 {strides = array<i32>} : memref<5x18x4xf32, #tpu.memory_space<vmem>>, vector<3x16x4xf32>,
    %cst_10 = arith.constant 0.000000e+00 : f32
    %10 = vector.broadcast %cst_10 : f32 to vector<16x4xf32>
    %c0_i32 = arith.constant 0 : i32
    %11 = arith.cmpi eq, %arg1, %c0_i32 : i32
    %12 = arith.extui %11 : i1 to i32
    %c0_i32_11 = arith.constant 0 : i32
    %13 = arith.cmpi ne, %12, %c0_i32_11 : i32
    scf.if %13 {
      %c0_59 = arith.constant 0 : index
      %c1_60 = arith.constant 1 : index
      %c0_61 = arith.constant 0 : index
      %54 = vector.load %arg8[%c0_59, %c1_60, %c0_61] : memref<5x18x4xf32, #tpu.memory_space<vmem>>, vector<1x16x4xf32>
      %55 = vector.shape_cast %54 : vector<1x16x4xf32> to vector<16x4xf32>
      %56 = vector.shape_cast %10 : vector<16x4xf32> to vector<1x16x4xf32>
      tpu.vector_store %arg8[%c0_59, %c1_60, %c0_61], %56 {strides = array<i32>} : memref<5x18x4xf32, #tpu.memory_space<vmem>>, vector<1x16x4xf32>,
    } else {
    }
    %c0_i32_12 = arith.constant 0 : i32
    %14 = arith.cmpi sgt, %arg1, %c0_i32_12 : i32
    %15 = arith.extui %14 : i1 to i32
    %c0_i32_13 = arith.constant 0 : i32
    %16 = arith.cmpi ne, %15, %c0_i32_13 : i32
    scf.if %16 {
      %c0_59 = arith.constant 0 : index
      %c0_60 = arith.constant 0 : index
      %c0_61 = arith.constant 0 : index
      %c0_62 = arith.constant 0 : index
      %54 = vector.load %arg2[%c0_59, %c0_60, %c0_61, %c0_62] : memref<1x1x16x4xf32, #tpu.memory_space<vmem>>, vector<1x1x16x4xf32>
      %55 = vector.shape_cast %54 : vector<1x1x16x4xf32> to vector<16x4xf32>
      %c0_63 = arith.constant 0 : index
      %c1_64 = arith.constant 1 : index
      %c0_65 = arith.constant 0 : index
      %56 = vector.load %arg8[%c0_63, %c1_64, %c0_65] : memref<5x18x4xf32, #tpu.memory_space<vmem>>, vector<1x16x4xf32>
      %57 = vector.shape_cast %56 : vector<1x16x4xf32> to vector<16x4xf32>
      %58 = vector.shape_cast %55 : vector<16x4xf32> to vector<1x16x4xf32>
      tpu.vector_store %arg8[%c0_63, %c1_64, %c0_65], %58 {strides = array<i32>} : memref<5x18x4xf32, #tpu.memory_space<vmem>>, vector<1x16x4xf32>,
    } else {
    }
    %c5_i32 = arith.constant 5 : i32
    %17 = arith.cmpi eq, %arg1, %c5_i32 : i32
    %18 = arith.extui %17 : i1 to i32
    %c0_i32_14 = arith.constant 0 : i32
    %19 = arith.cmpi ne, %18, %c0_i32_14 : i32
    scf.if %19 {
      %c4_59 = arith.constant 4 : index
      %c1_60 = arith.constant 1 : index
      %c0_61 = arith.constant 0 : index
      %54 = vector.load %arg8[%c4_59, %c1_60, %c0_61] : memref<5x18x4xf32, #tpu.memory_space<vmem>>, vector<1x16x4xf32>
      %55 = vector.shape_cast %54 : vector<1x16x4xf32> to vector<16x4xf32>
      %56 = vector.shape_cast %10 : vector<16x4xf32> to vector<1x16x4xf32>
      tpu.vector_store %arg8[%c4_59, %c1_60, %c0_61], %56 {strides = array<i32>} : memref<5x18x4xf32, #tpu.memory_space<vmem>>, vector<1x16x4xf32>,
    } else {
    }
    %c5_i32_15 = arith.constant 5 : i32
    %20 = arith.cmpi slt, %arg1, %c5_i32_15 : i32
    %21 = arith.extui %20 : i1 to i32
    %c0_i32_16 = arith.constant 0 : i32
    %22 = arith.cmpi ne, %21, %c0_i32_16 : i32
    scf.if %22 {
      %c0_59 = arith.constant 0 : index
      %c0_60 = arith.constant 0 : index
      %c0_61 = arith.constant 0 : index
      %c0_62 = arith.constant 0 : index
      %54 = vector.load %arg4[%c0_59, %c0_60, %c0_61, %c0_62] : memref<1x1x16x4xf32, #tpu.memory_space<vmem>>, vector<1x1x16x4xf32>
      %55 = vector.shape_cast %54 : vector<1x1x16x4xf32> to vector<16x4xf32>
      %c4_63 = arith.constant 4 : index
      %c1_64 = arith.constant 1 : index
      %c0_65 = arith.constant 0 : index
      %56 = vector.load %arg8[%c4_63, %c1_64, %c0_65] : memref<5x18x4xf32, #tpu.memory_space<vmem>>, vector<1x16x4xf32>
      %57 = vector.shape_cast %56 : vector<1x16x4xf32> to vector<16x4xf32>
      %58 = vector.shape_cast %55 : vector<16x4xf32> to vector<1x16x4xf32>
      tpu.vector_store %arg8[%c4_63, %c1_64, %c0_65], %58 {strides = array<i32>} : memref<5x18x4xf32, #tpu.memory_space<vmem>>, vector<1x16x4xf32>,
    } else {
    }
    %c0_17 = arith.constant 0 : index
    %c0_18 = arith.constant 0 : index
    %c0_19 = arith.constant 0 : index
    %23 = vector.load %arg8[%c0_17, %c0_18, %c0_19] : memref<5x18x4xf32, #tpu.memory_space<vmem>>, vector<5x16x4xf32>
    %c0_20 = arith.constant 0 : index
    %c0_21 = arith.constant 0 : index
    %c0_22 = arith.constant 0 : index
    %24 = vector.load %arg9[%c0_20, %c0_21, %c0_22] : memref<5x16x12xf32, #tpu.memory_space<vmem>>, vector<5x16x4xf32>
    tpu.vector_store %arg9[%c0_20, %c0_21, %c0_22], %23 {strides = array<i32>} : memref<5x16x12xf32, #tpu.memory_space<vmem>>, vector<5x16x4xf32>,
    %c0_23 = arith.constant 0 : index
    %c1_24 = arith.constant 1 : index
    %c0_25 = arith.constant 0 : index
    %25 = vector.load %arg8[%c0_23, %c1_24, %c0_25] : memref<5x18x4xf32, #tpu.memory_space<vmem>>, vector<5x16x4xf32>
    %c0_26 = arith.constant 0 : index
    %c0_27 = arith.constant 0 : index
    %c4 = arith.constant 4 : index
    %26 = vector.load %arg9[%c0_26, %c0_27, %c4] : memref<5x16x12xf32, #tpu.memory_space<vmem>>, vector<5x16x4xf32>
    tpu.vector_store %arg9[%c0_26, %c0_27, %c4], %25 {strides = array<i32>} : memref<5x16x12xf32, #tpu.memory_space<vmem>>, vector<5x16x4xf32>,
    %c0_28 = arith.constant 0 : index
    %c2 = arith.constant 2 : index
    %c0_29 = arith.constant 0 : index
    %27 = vector.load %arg8[%c0_28, %c2, %c0_29] : memref<5x18x4xf32, #tpu.memory_space<vmem>>, vector<5x16x4xf32>
    %c0_30 = arith.constant 0 : index
    %c0_31 = arith.constant 0 : index
    %c8 = arith.constant 8 : index
    %28 = vector.load %arg9[%c0_30, %c0_31, %c8] : memref<5x16x12xf32, #tpu.memory_space<vmem>>, vector<5x16x4xf32>
    tpu.vector_store %arg9[%c0_30, %c0_31, %c8], %27 {strides = array<i32>} : memref<5x16x12xf32, #tpu.memory_space<vmem>>, vector<5x16x4xf32>,
    %c0_32 = arith.constant 0 : index
    %c0_33 = arith.constant 0 : index
    %29 = vector.load %arg6[%c0_32, %c0_33] : memref<1x8xf32, #tpu.memory_space<vmem>>, vector<1x8xf32>
    %30 = vector.shape_cast %29 : vector<1x8xf32> to vector<1x8xf32>
    %31 = vector.broadcast %30 : vector<1x8xf32> to vector<48x8xf32>
    %c0_34 = arith.constant 0 : index
    %c0_35 = arith.constant 0 : index
    %c0_36 = arith.constant 0 : index
    %32 = vector.load %arg9[%c0_34, %c0_35, %c0_36] : memref<5x16x12xf32, #tpu.memory_space<vmem>>, vector<3x16x12xf32>
    %33 = vector.shape_cast %32 : vector<3x16x12xf32> to vector<48x12xf32>
    %c0_37 = arith.constant 0 : index
    %c0_38 = arith.constant 0 : index
    %c0_39 = arith.constant 0 : index
    %34 = vector.load %arg5[%c0_37, %c0_38, %c0_39] : memref<3x12x8xf32, #tpu.memory_space<vmem>>, vector<1x12x8xf32>
    %35 = vector.shape_cast %34 : vector<1x12x8xf32> to vector<12x8xf32>
    %cst_40 = arith.constant dense<0.000000e+00> : vector<48x8xf32>
    %36 = tpu.matmul %33, %35, %cst_40 {dimension_numbers = #tpu.dot_dimension_numbers<[1], [0], [0], [1], [0, 0, 1, 1], [], []>} : vector<48x12xf32>, vector<12x8xf32>, vector<48x8xf32> -> vector<48x8xf32>
    %37 = arith.addf %31, %36 : vector<48x8xf32>
    %c1_41 = arith.constant 1 : index
    %c0_42 = arith.constant 0 : index
    %c0_43 = arith.constant 0 : index
    %38 = vector.load %arg9[%c1_41, %c0_42, %c0_43] : memref<5x16x12xf32, #tpu.memory_space<vmem>>, vector<3x16x12xf32>
    %39 = vector.shape_cast %38 : vector<3x16x12xf32> to vector<48x12xf32>
    %c1_44 = arith.constant 1 : index
    %c0_45 = arith.constant 0 : index
    %c0_46 = arith.constant 0 : index
    %40 = vector.load %arg5[%c1_44, %c0_45, %c0_46] : memref<3x12x8xf32, #tpu.memory_space<vmem>>, vector<1x12x8xf32>
    %41 = vector.shape_cast %40 : vector<1x12x8xf32> to vector<12x8xf32>
    %cst_47 = arith.constant dense<0.000000e+00> : vector<48x8xf32>
    %42 = tpu.matmul %39, %41, %cst_47 {dimension_numbers = #tpu.dot_dimension_numbers<[1], [0], [0], [1], [0, 0, 1, 1], [], []>} : vector<48x12xf32>, vector<12x8xf32>, vector<48x8xf32> -> vector<48x8xf32>
    %43 = arith.addf %37, %42 : vector<48x8xf32>
    %c2_48 = arith.constant 2 : index
    %c0_49 = arith.constant 0 : index
    %c0_50 = arith.constant 0 : index
    %44 = vector.load %arg9[%c2_48, %c0_49, %c0_50] : memref<5x16x12xf32, #tpu.memory_space<vmem>>, vector<3x16x12xf32>
    %45 = vector.shape_cast %44 : vector<3x16x12xf32> to vector<48x12xf32>
    %c2_51 = arith.constant 2 : index
    %c0_52 = arith.constant 0 : index
    %c0_53 = arith.constant 0 : index
    %46 = vector.load %arg5[%c2_51, %c0_52, %c0_53] : memref<3x12x8xf32, #tpu.memory_space<vmem>>, vector<1x12x8xf32>
    %47 = vector.shape_cast %46 : vector<1x12x8xf32> to vector<12x8xf32>
    %cst_54 = arith.constant dense<0.000000e+00> : vector<48x8xf32>
    %48 = tpu.matmul %45, %47, %cst_54 {dimension_numbers = #tpu.dot_dimension_numbers<[1], [0], [0], [1], [0, 0, 1, 1], [], []>} : vector<48x12xf32>, vector<12x8xf32>, vector<48x8xf32> -> vector<48x8xf32>
    %49 = arith.addf %43, %48 : vector<48x8xf32>
    %50 = vector.shape_cast %49 : vector<48x8xf32> to vector<3x16x8xf32>
    %c0_55 = arith.constant 0 : index
    %c0_56 = arith.constant 0 : index
    %c0_57 = arith.constant 0 : index
    %c0_58 = arith.constant 0 : index
    %51 = vector.load %arg7[%c0_55, %c0_56, %c0_57, %c0_58] : memref<1x3x16x8xf32, #tpu.memory_space<vmem>>, vector<1x3x16x8xf32>
    %52 = vector.shape_cast %51 : vector<1x3x16x8xf32> to vector<3x16x8xf32>
    %53 = vector.shape_cast %50 : vector<3x16x8xf32> to vector<1x3x16x8xf32>
    tpu.vector_store %arg7[%c0_55, %c0_56, %c0_57, %c0_58], %53 {strides = array<i32>} : memref<1x3x16x8xf32, #tpu.memory_space<vmem>>, vector<1x3x16x8xf32>,
    return
  }
  func.func @transform_0(%arg0: i32, %arg1: i32) -> (i32, i32, i32, i32) {
    %c3_i32 = arith.constant 3 : i32
    %0 = arith.muli %arg1, %c3_i32 : i32
    %c1_i32 = arith.constant 1 : i32
    %1 = arith.subi %0, %c1_i32 : i32
    %c0_i32 = arith.constant 0 : i32
    %2 = arith.maxsi %1, %c0_i32 : i32
    %c0_i32_0 = arith.constant 0 : i32
    %c0_i32_1 = arith.constant 0 : i32
    %c0_i32_2 = arith.constant 0 : i32
    return %arg0, %2, %c0_i32_0, %c0_i32_1 : i32, i32, i32, i32
  }
  func.func @transform_1(%arg0: i32, %arg1: i32) -> (i32, i32, i32, i32) {
    %c0_i32 = arith.constant 0 : i32
    %c0_i32_0 = arith.constant 0 : i32
    %c0_i32_1 = arith.constant 0 : i32
    return %arg0, %arg1, %c0_i32, %c0_i32_0 : i32, i32, i32, i32
  }
  func.func @transform_2(%arg0: i32, %arg1: i32) -> (i32, i32, i32, i32) {
    %c1_i32 = arith.constant 1 : i32
    %0 = arith.addi %arg1, %c1_i32 : i32
    %c3_i32 = arith.constant 3 : i32
    %1 = arith.muli %0, %c3_i32 : i32
    %c17_i32 = arith.constant 17 : i32
    %2 = arith.minsi %1, %c17_i32 : i32
    %c0_i32 = arith.constant 0 : i32
    %c0_i32_0 = arith.constant 0 : i32
    %c0_i32_1 = arith.constant 0 : i32
    return %arg0, %2, %c0_i32, %c0_i32_0 : i32, i32, i32, i32
  }
  func.func @transform_3(%arg0: i32, %arg1: i32) -> (i32, i32, i32) {
    %c0_i32 = arith.constant 0 : i32
    %c0_i32_0 = arith.constant 0 : i32
    %c0_i32_1 = arith.constant 0 : i32
    %c0_i32_2 = arith.constant 0 : i32
    return %c0_i32, %c0_i32_0, %c0_i32_1 : i32, i32, i32
  }
  func.func @transform_4(%arg0: i32, %arg1: i32) -> (i32, i32) {
    %c0_i32 = arith.constant 0 : i32
    %c0_i32_0 = arith.constant 0 : i32
    %c0_i32_1 = arith.constant 0 : i32
    return %c0_i32, %c0_i32_0 : i32, i32
  }
  func.func @transform_5(%arg0: i32, %arg1: i32) -> (i32, i32, i32, i32) {
    %c0_i32 = arith.constant 0 : i32
    %c0_i32_0 = arith.constant 0 : i32
    %c0_i32_1 = arith.constant 0 : i32
    return %arg0, %arg1, %c0_i32, %c0_i32_0 : i32, i32, i32, i32
  }
}

</mosaic_0001>

<bundles_post_ra>
// kernel: tpu_custom_call.1
= control target key start
LH: loop header
LB: loop body
LE: loop exit
PB: predicated region body
PF: predicated region fallthrough
CT: control target
= control target key end

     0   :  { %s1423_s18 = smov 0   ;;  %s1425_s19 = smov 0   ;;  %s1653_s0 = inlined_call_operand.vmem [shape: f32[2,18,16,4], index: 0, kind: input, shape index: {}]   ;;  %s1654_s1 = inlined_call_operand.vmem [shape: f32[2,18,16,4], index: 1, kind: input, shape index: {}]   ;;  %s1655_s2 = inlined_call_operand.vmem [shape: f32[2,18,16,4], index: 2, kind: input, shape index: {}]   ;;  %s1656_s3 = inlined_call_operand.vmem [shape: f32[3,12,8], index: 3, kind: input, shape index: {}]   ;;  %s1657_s4 = inlined_call_operand.vmem [shape: f32[1,8], index: 4, kind: input, shape index: {}]   ;;  %s1658_s5 = inlined_call_operand.vmem [shape: f32[2,18,16,8], index: 5, kind: output, shape index: {}]  }
   0x1   :  { %s1427_s20 = smov 0   ;;  %s1429_s21 = smov 0  }
   0x2   :  { %s1431_s22 = smov 0  }
   0x3 LB: > { %s24_s23 = sadd.s32 1, %s1377_s20  ;;  %s27_s24 = sadd.s32 1, %s1381_s21  ;;  %s1385_s22 = sphi %s1431_s22, %s15_s22   ;;  %s1381_s21 = sphi %s1429_s21, %s1664_s21   ;;  %s1377_s20 = sphi %s1427_s20, %s1663_s20   ;;  %s1373_s19 = sphi %s1425_s19, %s1662_s19   ;;  %s1369_s18 = sphi %s1423_s18, %s1661_s18  }
   0x4   : > { %p25_p0 = scmp.ge.s32.totalorder %s24_s23, 6  ;;  %p1147_p1 = scmp.ge.s32.totalorder %s1385_s22, 1 }
   0x5   : > { %p273_p2 = scmp.lt.s32.totalorder %s1385_s22, 13 }
   0x6   : > { %s1666_s23 = smov (%p25_p0, %s24_s23), 0  ;;  %s1668_s24 = smov (!%p25_p0, %s27_s24), %s1381_s21 }
   0x7   : > { %p274_p3 = pnand %p1147_p1, %p273_p2  ;;  %p29_p4 = scmp.ge.s32.totalorder %s1668_s24, 2 }
   0x8   : > { %vm393_vm0 = vcmask (!%p274_p3), 24576   ;;  %s337_s25 = smul.u32 (!%p274_p3), 3, %s1369_s18  ;;  %p341_p5 = scmp.lt.s32.totalorder (!%p274_p3), %s1373_s19, 1  ;;  %v1387_v0 = vmov (!%p274_p3), 0.0   ;;  %vm411_vm1 = vcmask (!%p274_p3), 31744  }
   0x9   : > { %s1670_s24 = smov (%p29_p4, %s1668_s24), 0  ;;  %277 = sbr.rel (%p274_p3) target bundleno = 435 (0x1b3), region = 40 }
   0xa   : > { %394 = vst.msk [vmem:[#allocation2] sm:$0x1] (!%p274_p3), %vm393_vm0, %v1387_v0  ;;  %395 = vst.msk [vmem:[#allocation2 + $0x18] sm:$0x1] (!%p274_p3), %vm393_vm0, %v1387_v0  ;;  %s1148_s26 = sadd.s32 (!%p274_p3), 4294967295, %s337_s25  ;;  %p357_p6 = scmp.lt.s32.totalorder (!%p274_p3), %s337_s25, 17 }
   0xb   : > { %396 = vst.msk [vmem:[#allocation2 + $0x30] sm:$0x1] (!%p274_p3), %vm393_vm0, %v1387_v0  ;;  %397 = vst.msk [vmem:[#allocation2 + $0x48] sm:$0x1] (!%p274_p3), %vm393_vm0, %v1387_v0  ;;  %p339_p7 = scmp.gt.s32.totalorder (!%p274_p3), %s1148_s26, 0  ;;  %p1149_p8 = scmp.lt.s32.totalorder (!%p274_p3), %s1148_s26, 17 }
   0xc   : > { %398 = vst.msk [vmem:[#allocation2 + $0x60] sm:$0x1] (!%p274_p3), %vm393_vm0, %v1387_v0  ;;  %399 = vst.msk [vmem:[#allocation2 + $0x11] sm:$0x1] (!%p274_p3), %vm393_vm0, %v1387_v0  ;;  %s365_s28 = sadd.s32 (!%p274_p3), 1, %s1369_s18  ;;  %p1165_p10 = scmp.ne.s32.totalorder (!%p274_p3), %s1369_s18, 0 }
   0xd   : > { %400 = vst.msk [vmem:[#allocation2 + $0x29] sm:$0x1] (!%p274_p3), %vm393_vm0, %v1387_v0  ;;  %401 = vst.msk [vmem:[#allocation2 + $0x41] sm:$0x1] (!%p274_p3), %vm393_vm0, %v1387_v0  ;;  %s366_s30 = smul.u32 (!%p274_p3), 3, %s365_s28 }
   0xe   : > { %402 = vst.msk [vmem:[#allocation2 + $0x59] sm:$0x1] (!%p274_p3), %vm393_vm0, %v1387_v0  ;;  %403 = vst.msk [vmem:[#allocation2 + $0x71] sm:$0x1] (!%p274_p3), %vm393_vm0, %v1387_v0 }
   0xf   : > { %p367_p9 = scmp.lt.s32.totalorder (!%p274_p3), %s366_s30, 17 }
  0x10   : > { %s1672_s19 = smov (!%p341_p5, %s1373_s19), 1  ;;  %s1674_s26 = smov (!%p339_p7, %s1148_s26), 0 }
  0x11   : > { %s1462_s27 = smul.u32 36, %s1672_s19  ;;  %s1676_s26 = smov (!%p1149_p8, %s1674_s26), 17  ;;  %v1388_v7 = vmov (!%p1165_p10), 0.0  }
  0x12   : > { %s1678_s25 = smov (!%p357_p6, %s337_s25), 17  ;;  %s1154_s29 = sshll.u32 %s1676_s26, 1  ;;  %422 = vst.msk [vmem:[#allocation2 + $0x1] sm:$0xff] (!%p1165_p10), %vm411_vm1, %v1388_v7  ;;  %423 = vst.msk [vmem:[#allocation2 + $0x9] sm:$0xff] (!%p1165_p10), %vm411_vm1, %v1388_v7 }
  0x13   : > { %s347_s6 = sadd.s32 %s1462_s27, %s1154_s29  ;;  %s1156_s7 = sshll.u32 %s1678_s25, 1 }
  0x14   : > { %s1155_s8 = sshll.u32 %s347_s6, 3  ;;  %s361_s9 = sadd.s32 %s1462_s27, %s1156_s7 }
  0x15   : > { %s1470_s12 = scalar_lea.vmem %s1653_s0, %s1155_s8  ;;  %s1157_s13 = sshll.u32 %s361_s9, 3 }
  0x16   : > { %s363_s16 = scalar_lea.vmem %s1654_s1, %s1157_s13  ;;  %s1478_s26 = scalar_lea.vmem %s1658_s5, %s1157_s13 }
  0x17   : > { %v404_v1 = vld [vmem:[%s363_s16] sm:$0xff]  ;;  %v405_v2 = vld [vmem:[%s363_s16 + $0x8] sm:$0xff]  ;;  %v406_v3 = vld [vmem:[%s363_s16 + $0x10] sm:$0xff]  ;;  %s368_s25 = scalar_select %p367_p9, %s366_s30, 17 }
  0x18   : > { %412 = vst.msk [vmem:[#allocation2 + $0x19] sm:$0xff] %vm411_vm1, %v404_v1  ;;  %413 = vst.msk [vmem:[#allocation2 + $0x21] sm:$0xff] %vm411_vm1, %v405_v2  ;;  %v407_v4 = vld [vmem:[%s363_s16 + $0x18] sm:$0xff]  ;;  %v408_v5 = vld [vmem:[%s363_s16 + $0x20] sm:$0xff]  ;;  %421 = sbr.rel (%p1165_p10) target bundleno = 31 (0x1f), region = 44 }
  0x19   : > { %414 = vst.msk [vmem:[#allocation2 + $0x31] sm:$0xff] %vm411_vm1, %v406_v3  ;;  %v409_v6 = vld [vmem:[%s363_s16 + $0x28] sm:$0xff]  ;;  %415 = vst.msk [vmem:[#allocation2 + $0x39] sm:$0xff] %vm411_vm1, %v407_v4  ;;  %s1680_s25 = smov (!%p367_p9, %s368_s25), 17 }
  0x1a   : > { %416 = vst.msk [vmem:[#allocation2 + $0x49] sm:$0xff] %vm411_vm1, %v408_v5  ;;  %417 = vst.msk [vmem:[#allocation2 + $0x51] sm:$0xff] %vm411_vm1, %v409_v6  ;;  %s1161_s28 = sshll.u32 %s1680_s25, 1 }
  0x1b   : > { %s375_s29 = sadd.s32 %s1462_s27, %s1161_s28 }
  0x1c   : > { %s1162_s6 = sshll.u32 %s375_s29, 3 }
  0x1d   : > { %s377_s9 = scalar_lea.vmem %s1655_s2, %s1162_s6 }
  0x1f PF: > { %p1166_p11 = scmp.le.s32.totalorder %s1369_s18, 0 }
  0x20   : > { %v428_v8 = vld [vmem:[%s1470_s12] sm:$0xff] (!%p1166_p11)  ;;  %v429_v9 = vld [vmem:[%s1470_s12 + $0x8] sm:$0xff] (!%p1166_p11) }
  0x21   : > { %427 = sbr.rel (%p1166_p11) target bundleno = 40 (0x28), region = 48  ;;  %430 = vst.msk [vmem:[#allocation2 + $0x1] sm:$0xff] (!%p1166_p11), %vm411_vm1, %v428_v8  ;;  %431 = vst.msk [vmem:[#allocation2 + $0x9] sm:$0xff] (!%p1166_p11), %vm411_vm1, %v429_v9 }
  0x28 PF: > { %p1167_p12 = scmp.ne.s32.totalorder %s1369_s18, 5 }
  0x29   : > { %v1389_v10 = vmov (!%p1167_p12), 0.0  }
  0x2a   : > { %435 = sbr.rel (%p1167_p12) target bundleno = 49 (0x31), region = 52  ;;  %437 = vst.msk [vmem:[#allocation2 + $0x61] sm:$0xff] (!%p1167_p12), %vm411_vm1, %v1389_v10  ;;  %438 = vst.msk [vmem:[#allocation2 + $0x69] sm:$0xff] (!%p1167_p12), %vm411_vm1, %v1389_v10 }
  0x31 PF: > { %p1168_p13 = scmp.ge.s32.totalorder %s1369_s18, 5 }
  0x32   : > { %v443_v11 = vld [vmem:[%s377_s9] sm:$0xff] (!%p1168_p13)  ;;  %v444_v12 = vld [vmem:[%s377_s9 + $0x8] sm:$0xff] (!%p1168_p13) }
  0x33   : > { %442 = sbr.rel (%p1168_p13) target bundleno = 58 (0x3a), region = 56  ;;  %446 = vst.msk [vmem:[#allocation2 + $0x61] sm:$0xff] (!%p1168_p13), %vm411_vm1, %v443_v11  ;;  %447 = vst.msk [vmem:[#allocation2 + $0x69] sm:$0xff] (!%p1168_p13), %vm411_vm1, %v444_v12 }
  0x3a PF: > { %v468_v13 = vld [vmem:[#allocation2 + $0x1] sm:$0xff]  ;;  %s1390_s27 = smov 4   ;;  %s1391_s30 = smov 8   ;;  %v469_v15 = vld [vmem:[#allocation2 + $0x9] sm:$0xff]  ;;  %v470_v16 = vld [vmem:[#allocation2 + $0x19] sm:$0xff]  ;;  %vm624_vm2 = vcmask 1043456  }
  0x3b   : > { %v529_v14 = vld [vmem:[#allocation2 + $0x2] sm:$0xff]  ;;  %488 = vrot.lane.b32.xlu0 %v468_v13, %s1390_s27  ;;  %v530_v17 = vld [vmem:[#allocation2 + $0xa] sm:$0xff]  ;;  %v450_v21 = vld [vmem:[#allocation2 + $0x18] sm:$0xff]  ;;  %vm1392_vm3 = vmmov 1   ;;  %vm518_vm5 = vcmask 64544   ;;  %vm579_vm6 = vcmask 97344  }
  0x3c   : > { %549 = vrot.lane.b32.xlu1 %v529_v14, %s1391_s30  ;;  %v471_v18 = vld [vmem:[#allocation2 + $0x21] sm:$0xff]  ;;  %460 = vst.msk [vmem:[#allocation3 + $0x10] sm:$0xff] %vm411_vm1, %v450_v21  ;;  %vm1521_vm4 = vmpackc.low %vm624_vm2, %vm1392_vm3  ;;  %v452_v29 = vld [vmem:[#allocation2 + $0x30] sm:$0xff]  ;;  %vm605_vm7 = vcmask 97280   ;;  %vm993_vm8 = vcmask 64512  }
  0x3d   : > { %v448_v19 = vld [vmem:[#allocation2] sm:$0xff]  ;;  %v449_v20 = vld [vmem:[#allocation2 + $0x8] sm:$0xff]  ;;  %v453_v30 = vld [vmem:[#allocation2 + $0x38] sm:$0xff]  ;;  %462 = vst.msk [vmem:[#allocation3 + $0x20] sm:$0xff] %vm411_vm1, %v452_v29 }
  0x3e   : > { %458 = vst.msk [vmem:[#allocation3] sm:$0xff] %vm411_vm1, %v448_v19  ;;  %v451_v22 = vld [vmem:[#allocation2 + $0x20] sm:$0xff]  ;;  %459 = vst.msk [vmem:[#allocation3 + $0x8] sm:$0xff] %vm411_vm1, %v449_v20  ;;  %v604_v26 = vld [vmem:[%s1656_s3 + $0x8] sm:$0xf] }
  0x3f   : > { %490 = vrot.lane.b32.xlu0 %v469_v15, %s1390_s27  ;;  %v531_v23 = vld [vmem:[#allocation2 + $0x1a] sm:$0xff]  ;;  %v532_v24 = vld [vmem:[#allocation2 + $0x22] sm:$0xff]  ;;  %461 = vst.msk [vmem:[#allocation3 + $0x18] sm:$0xff] %vm411_vm1, %v451_v22  ;;  %v1177_v31 = vld [vmem:[%s1656_s3 + $0x10] sm:$0xff] }
  0x40   : > { %492 = vrot.lane.b32.xlu1 %v470_v16, %s1390_s27  ;;  %v603_v25 = vld [vmem:[%s1656_s3] sm:$0xff]  ;;  %463 = vst.msk [vmem:[#allocation3 + $0x28] sm:$0xff] %vm411_vm1, %v453_v30  ;;  %v1178_v32 = vld [vmem:[%s1656_s3 + $0x18] sm:$0xf]  ;;  %v454_v33 = vld [vmem:[#allocation2 + $0x48] sm:$0xff] }
  0x41   : > { %v1262_v28 = vpack.c.bf16 %v604_v26, %v603_v25  ;;  %v1186_v34 = vld [vmem:[%s1656_s3 + $0x20] sm:$0xff]  ;;  %v1540_v35 = vpack.c.bf16 %v1178_v32, %v1177_v31  ;;  %464 = vst.msk [vmem:[#allocation3 + $0x30] sm:$0xff] %vm411_vm1, %v454_v33  ;;  %v455_v36 = vld [vmem:[#allocation2 + $0x50] sm:$0xff]  ;;  %v1187_v37 = vld [vmem:[%s1656_s3 + $0x28] sm:$0xf] }
  0x42   : > { %465 = vst.msk [vmem:[#allocation3 + $0x38] sm:$0xff] %vm411_vm1, %v455_v36  ;;  %v1549_v38 = vpack.c.bf16 %v1187_v37, %v1186_v34  ;;  %v472_v39 = vld [vmem:[#allocation2 + $0x31] sm:$0xff]  ;;  %v473_v40 = vld [vmem:[#allocation2 + $0x39] sm:$0xff]  ;;  %v457_v44 = vld [vmem:[#allocation2 + $0x68] sm:$0xff] }
  0x43   : > { %551 = vrot.lane.b32.xlu0 %v530_v17, %s1391_s30  ;;  %1264 = vmatprep.subr.msk.bf16.mxu1 %vm1521_vm4, %v1262_v28  ;;  %v533_v41 = vld [vmem:[#allocation2 + $0x32] sm:$0xff]  ;;  %v534_v42 = vld [vmem:[#allocation2 + $0x3a] sm:$0xff]  ;;  %467 = vst.msk [vmem:[#allocation3 + $0x48] sm:$0xff] %vm411_vm1, %v457_v44  ;;  %v474_v45 = vld [vmem:[#allocation2 + $0x49] sm:$0xff] }
  0x44   : > { %494 = vrot.lane.b32.xlu1 %v471_v18, %s1390_s27  ;;  %1267 = vmatpush3.bf16.msk.msra.mxu1 %vm1521_vm4, %v1262_v28  ;;  %v456_v43 = vld [vmem:[#allocation2 + $0x60] sm:$0xff]  ;;  %v475_v46 = vld [vmem:[#allocation2 + $0x51] sm:$0xff]  ;;  %v477_v50 = vld [vmem:[#allocation2 + $0x69] sm:$0xff] }
  0x45   : > { %1270 = vmatprep.subr.msk.bf16.mxu0 %vm1521_vm4, %v1540_v35  ;;  %1280 = vmatprep.subr.msk.bf16.mxu1 %vm1521_vm4, %v1540_v35  ;;  %466 = vst.msk [vmem:[#allocation3 + $0x40] sm:$0xff] %vm411_vm1, %v456_v43  ;;  %v535_v47 = vld [vmem:[#allocation2 + $0x4a] sm:$0xff]  ;;  %v536_v48 = vld [vmem:[#allocation2 + $0x52] sm:$0xff]  ;;  %v476_v49 = vld [vmem:[#allocation2 + $0x61] sm:$0xff] }
  0x46   : > { %1273 = vmatpush3.bf16.msk.msra.mxu0 %vm1521_vm4, %v1540_v35  ;;  %v537_v51 = vld [vmem:[#allocation2 + $0x62] sm:$0xff]  ;;  %v538_v52 = vld [vmem:[#allocation2 + $0x6a] sm:$0xff]  ;;  %v1169_v21 = vld [vmem:[%s1657_s4] ss:$0 sm:$0xff] }
  0x47   : > { %553 = vrot.lane.b32.xlu0 %v531_v23, %s1391_s30  ;;  %1276 = vmatprep.subr.msk.bf16.mxu0 %vm1521_vm4, %v1549_v38 }
  0x48   : > { %555 = vrot.lane.b32.xlu1 %v532_v24, %s1391_s30 }
  0x4b   : > { %496 = vrot.lane.b32.xlu0 %v472_v39, %s1390_s27 }
  0x4c   : > { %498 = vrot.lane.b32.xlu1 %v473_v40, %s1390_s27 }
  0x4f   : > { %557 = vrot.lane.b32.xlu0 %v533_v41, %s1391_s30 }
  0x50   : > { %559 = vrot.lane.b32.xlu1 %v534_v42, %s1391_s30 }
  0x53   : > { %500 = vrot.lane.b32.xlu0 %v474_v45, %s1390_s27 }
  0x54   : > { %502 = vrot.lane.b32.xlu1 %v475_v46, %s1390_s27 }
  0x57   : > { %561 = vrot.lane.b32.xlu0 %v535_v47, %s1391_s30 }
  0x58   : > { %563 = vrot.lane.b32.xlu1 %v536_v48, %s1391_s30 }
  0x5b   : > { %504 = vrot.lane.b32.xlu0 %v476_v49, %s1390_s27 }
  0x5c   : > { %506 = vrot.lane.b32.xlu1 %v477_v50, %s1390_s27 }
  0x5f   : > { %565 = vrot.lane.b32.xlu0 %v537_v51, %s1391_s30 }
  0x60   : > { %567 = vrot.lane.b32.xlu1 %v538_v52, %s1391_s30 }
  0xad   : > { %v489_v53 = vpop.permute.xlu0 %488 }
  0xae   : > { %v550_v54 = vpop.permute.xlu1 %549  ;;  %519 = vst.msk [vmem:[#allocation3] sm:$0xff] %vm518_vm5, %v489_v53 }
  0xaf   : > { %580 = vst.msk [vmem:[#allocation3] sm:$0xff] %vm579_vm6, %v550_v54 }
  0xb1   : > { %v491_v55 = vpop.permute.xlu0 %490 }
  0xb2   : > { %v493_v56 = vpop.permute.xlu1 %492  ;;  %520 = vst.msk [vmem:[#allocation3 + $0x8] sm:$0xff] %vm518_vm5, %v491_v55 }
  0xb3   : > { %521 = vst.msk [vmem:[#allocation3 + $0x10] sm:$0xff] %vm518_vm5, %v493_v56 }
  0xb5   : > { %v552_v57 = vpop.permute.xlu0 %551 }
  0xb6   : > { %v495_v58 = vpop.permute.xlu1 %494  ;;  %581 = vst.msk [vmem:[#allocation3 + $0x8] sm:$0xff] %vm579_vm6, %v552_v57  ;;  %v597_v59 = vld [vmem:[#allocation3] sm:$0xff] }
  0xb7   : > { %522 = vst.msk [vmem:[#allocation3 + $0x18] sm:$0xff] %vm518_vm5, %v495_v58  ;;  %1227 = vmatprep.mubr.msk.f32.mxu1 %vm605_vm7, %v597_v59 }
  0xb9   : > { %v554_v60 = vpop.permute.xlu0 %553 }
  0xba   : > { %v556_v61 = vpop.permute.xlu1 %555  ;;  %582 = vst.msk [vmem:[#allocation3 + $0x10] sm:$0xff] %vm579_vm6, %v554_v60 }
  0xbb   : > { %583 = vst.msk [vmem:[#allocation3 + $0x18] sm:$0xff] %vm579_vm6, %v556_v61 }
  0xbd   : > { %v497_v62 = vpop.permute.xlu0 %496  ;;  %v598_v0 = vld [vmem:[#allocation3 + $0x8] sm:$0xff] }
  0xbe   : > { %v499_v63 = vpop.permute.xlu1 %498  ;;  %523 = vst.msk [vmem:[#allocation3 + $0x20] sm:$0xff] %vm518_vm5, %v497_v62  ;;  %1228 = vmatmul.mubr.msk.f32.vlgmr.msra.gmra.mrb[0].mxu1 %vm605_vm7, %v598_v0 }
  0xbf   : > { %524 = vst.msk [vmem:[#allocation3 + $0x28] sm:$0xff] %vm518_vm5, %v499_v63  ;;  %1281 = vmatpush3.bf16.msk.msra.mxu1 %vm1521_vm4, %v1540_v35 }
  0xc1   : > { %v558_v1 = vpop.permute.xlu0 %557  ;;  %v599_v3 = vld [vmem:[#allocation3 + $0x10] sm:$0xff] }
  0xc2   : > { %v560_v2 = vpop.permute.xlu1 %559  ;;  %v600_v4 = vld [vmem:[#allocation3 + $0x18] sm:$0xff]  ;;  %584 = vst.msk [vmem:[#allocation3 + $0x20] sm:$0xff] %vm579_vm6, %v558_v1  ;;  %1230 = vmatprep.mubr.msk.f32.mxu1 %vm605_vm7, %v599_v3  ;;  %1240 = vmatprep.mubr.msk.f32.mxu0 %vm605_vm7, %v599_v3 }
  0xc3   : > { %585 = vst.msk [vmem:[#allocation3 + $0x28] sm:$0xff] %vm579_vm6, %v560_v2  ;;  %1231 = vmatmul.mubr.msk.f32.gmra.mrb[2].mxu1 %vm605_vm7, %v600_v4  ;;  %1241 = vmatmul.mubr.msk.f32.vlgmr.msra.gmra.mrb[0].mxu0 %vm605_vm7, %v600_v4 }
  0xc4   : > { %1279 = vmatpush3.bf16.msk.msra.mxu0 %vm1521_vm4, %v1549_v38 }
  0xc5   : > { %v501_v5 = vpop.permute.xlu0 %500 }
  0xc6   : > { %v503_v6 = vpop.permute.xlu1 %502  ;;  %525 = vst.msk [vmem:[#allocation3 + $0x30] sm:$0xff] %vm518_vm5, %v501_v5 }
  0xc7   : > { %526 = vst.msk [vmem:[#allocation3 + $0x38] sm:$0xff] %vm518_vm5, %v503_v6 }
  0xc9   : > { %v562_v7 = vpop.permute.xlu0 %561  ;;  %v601_v9 = vld [vmem:[#allocation3 + $0x20] sm:$0xff] }
  0xca   : > { %v564_v8 = vpop.permute.xlu1 %563  ;;  %v602_v10 = vld [vmem:[#allocation3 + $0x28] sm:$0xff]  ;;  %586 = vst.msk [vmem:[#allocation3 + $0x30] sm:$0xff] %vm579_vm6, %v562_v7  ;;  %1233 = vmatprep.mubr.msk.f32.mxu1 %vm605_vm7, %v601_v9  ;;  %1253 = vmatprep.mubr.msk.f32.mxu0 %vm605_vm7, %v601_v9 }
  0xcb   : > { %587 = vst.msk [vmem:[#allocation3 + $0x38] sm:$0xff] %vm579_vm6, %v564_v8  ;;  %1234 = vmatmul.mubr.msk.f32.gmra.mrb[4].mxu1 %vm605_vm7, %v602_v10  ;;  %1254 = vmatmul.mubr.msk.f32.vlgmr.msra.gmra.mrb[0].mxu0 %vm605_vm7, %v602_v10 }
  0xcc   : > { %1243 = vmatprep.mubr.msk.f32.mxu1 %vm605_vm7, %v601_v9 }
  0xcd   : > { %v505_v11 = vpop.permute.xlu0 %504 }
  0xce   : > { %v507_v12 = vpop.permute.xlu1 %506  ;;  %527 = vst.msk [vmem:[#allocation3 + $0x40] sm:$0xff] %vm518_vm5, %v505_v11 }
  0xcf   : > { %528 = vst.msk [vmem:[#allocation3 + $0x48] sm:$0xff] %vm518_vm5, %v507_v12  ;;  %1244 = vmatmul.mubr.msk.f32.vlgmr.msra.gmra.mrb[2].mxu1 %vm605_vm7, %v602_v10 }
  0xd1   : > { %v566_v13 = vpop.permute.xlu0 %565  ;;  %v734_v15 = vld [vmem:[#allocation3 + $0x30] sm:$0xff] }
  0xd2   : > { %v568_v14 = vpop.permute.xlu1 %567  ;;  %v735_v16 = vld [vmem:[#allocation3 + $0x38] sm:$0xff]  ;;  %588 = vst.msk [vmem:[#allocation3 + $0x40] sm:$0xff] %vm579_vm6, %v566_v13  ;;  %1246 = vmatprep.mubr.msk.f32.mxu1 %vm605_vm7, %v734_v15  ;;  %1256 = vmatprep.mubr.msk.f32.mxu0 %vm605_vm7, %v734_v15 }
  0xd3   : > { %589 = vst.msk [vmem:[#allocation3 + $0x48] sm:$0xff] %vm579_vm6, %v568_v14  ;;  %1247 = vmatmul.mubr.msk.f32.gmra.mrb[4].mxu1 %vm605_vm7, %v735_v16  ;;  %1257 = vmatmul.mubr.msk.f32.gmra.mrb[2].mxu0 %vm605_vm7, %v735_v16 }
  0xd9   : > { %v866_v17 = vld [vmem:[#allocation3 + $0x40] sm:$0xff] }
  0xda   : > { %v867_v18 = vld [vmem:[#allocation3 + $0x48] sm:$0xff]  ;;  %1259 = vmatprep.mubr.msk.f32.mxu0 %vm605_vm7, %v866_v17 }
  0xdb   : > { %1260 = vmatmul.mubr.msk.f32.gmra.mrb[4].mxu0 %vm605_vm7, %v867_v18 }
 0x191   : > { %v1229_v19 = vpop.f32.mrb[0].mxu1 }
 0x192   : > { %v694_v20 = vpop.f32.mrb[1].mxu1  ;;  %v724_v22 = vadd.f32 %v1229_v19, %v1169_v21 }
 0x193   : > { %v723_v23 = vadd.f32 %v1169_v21, %v694_v20 }
 0x19e   : > { %v1255_v24 = vpop.f32.mrb[0].mxu0 }
 0x19f   : > { %v1283_v25 = vadd.f32 %v1255_v24, %v724_v22  ;;  %v958_v26 = vpop.f32.mrb[1].mxu0 }
 0x1a0   : > { %v1285_v27 = vadd.f32 %v958_v26, %v723_v23 }
 0x1a1   : > { %995 = vst.msk [vmem:[%s1478_s26 + $0x8] sm:$0xff] %vm993_vm8, %v1283_v25 }
 0x1a2   : > { %994 = vst.msk [vmem:[%s1478_s26] sm:$0xff] %vm993_vm8, %v1285_v27  ;;  %v1245_v28 = vpop.f32.mrb[2].mxu1 }
 0x1a3   : > { %v836_v29 = vpop.f32.mrb[3].mxu1  ;;  %v1286_v30 = vadd.f32 %v1245_v28, %v1169_v21 }
 0x1a4   : > { %v1288_v31 = vadd.f32 %v1169_v21, %v836_v29 }
 0x1a6   : > { %v1248_v32 = vpop.f32.mrb[4].mxu1  ;;  %v1258_v33 = vpop.f32.mrb[2].mxu0 }
 0x1a7   : > { %v1287_v34 = vadd.f32 %v1286_v30, %v1258_v33  ;;  %v846_v35 = vpop.f32.mrb[5].mxu1  ;;  %v968_v36 = vpop.f32.mrb[3].mxu0  ;;  %v1290_v38 = vadd.f32 %v1248_v32, %v1169_v21 }
 0x1a8   : > { %v1289_v37 = vadd.f32 %v1288_v31, %v968_v36  ;;  %v1292_v39 = vadd.f32 %v1169_v21, %v846_v35 }
 0x1a9   : > { %997 = vst.msk [vmem:[%s1478_s26 + $0x18] sm:$0xff] %vm993_vm8, %v1287_v34 }
 0x1aa   : > { %996 = vst.msk [vmem:[%s1478_s26 + $0x10] sm:$0xff] %vm993_vm8, %v1289_v37 }
 0x1ae   : > { %v1261_v40 = vpop.f32.mrb[4].mxu0 }
 0x1af   : > { %v1291_v41 = vadd.f32 %v1290_v38, %v1261_v40  ;;  %v978_v42 = vpop.f32.mrb[5].mxu0 }
 0x1b0   : > { %v1293_v43 = vadd.f32 %v1292_v39, %v978_v42 }
 0x1b1   : > { %999 = vst.msk [vmem:[%s1478_s26 + $0x28] sm:$0xff] %vm993_vm8, %v1291_v41 }
 0x1b2   : > { %998 = vst.msk [vmem:[%s1478_s26 + $0x20] sm:$0xff] %vm993_vm8, %v1293_v43 }
 0x1b3 PF: > { %s15_s22 = sadd.s32 1, %s1385_s22   ;;  %s1661_s18 = smov %s1377_s20 }
 0x1b4   : > { %p12_p0 = scmp.ge.s32.totalorder %s15_s22, 14   ;;  %s1662_s19 = smov %s1381_s21 }
 0x1b5   : > { %s1663_s20 = smov %s1666_s23  ;;  %s1664_s21 = smov %s1670_s24 }
 0x1b6   :  { %14 = sbr.rel (!%p12_p0) target bundleno = 3 (0x3), region = 99 }

</bundles_post_ra>
